<compile_context>
chip_gen: v7x
topology: tpu7x:2x2x1
jax: 0.10.0
libtpu: 0.0.40
codegen_flags: <defaults>
</compile_context>

<pallas_src>
import jax
import jax.numpy as jnp
from jax import lax
from jax.experimental import pallas as pl
from jax.experimental.pallas import tpu as pltpu


def _round_up(x: int, m: int) -> int:
    return ((x + m - 1) // m) * m


# ---------------------------------------------------------------------------
# Path 1: fused set_memory + forward (single launch; J stays on-chip)
# ---------------------------------------------------------------------------
def _fused_set_and_forward_kernel(w_ref, v_ref, kt_ref, q_ref, o_ref):
    # Row-scale the values by their weights (VPU, f32-friendly).
    wv = w_ref[...] * v_ref[...]                                  # (L, d_v_p)
    # J^T = k^T @ (w ⊙ v): canonical (d_k, L) x (L, d_v_p) MXU contraction,
    # f32 accumulate.  J^T is formed in VMEM/vregs only — never written to HBM.
    j_t = lax.dot_general(
        kt_ref[...], wv,
        dimension_numbers=(((1,), (0,)), ((), ())),
        preferred_element_type=jnp.float32,
    )
    # out = q @ J^T: canonical (L, d_k) x (d_k, d_v_p) MXU contraction.
    # Keep everything in f32 until the single epilogue cast (cheap on v6e/v7x,
    # avoids hidden bf16 converts on v5e).
    o_ref[...] = lax.dot_general(
        q_ref[...], j_t.astype(q_ref.dtype),
        dimension_numbers=(((1,), (0,)), ((), ())),
        preferred_element_type=jnp.float32,
    ).astype(o_ref.dtype)


def correlation_memory_set_and_forward(q, k, v, w):
    """Fused set_memory + forward: out = q @ J.T with J = sum_l w_l v_l k_l^T.

    Single pallas_call; intended for the small/medium (single-block) shapes
    this module targets, where a standalone matmul kernel is pure overhead.
    """
    L, d_k = q.shape
    L2, d_v = v.shape
    assert k.shape == (L, d_k) and L2 == L and w.shape == (L,)

    d_v_p = _round_up(d_v, 128)              # lane-dense output (unmasked vst)
    v_p = v if d_v_p == d_v else jnp.pad(v, ((0, 0), (0, d_v_p - d_v)))
    w2 = w.reshape(L, 1)                     # 2-D for clean VMEM layout / broadcast
    k_t = jnp.swapaxes(k, 0, 1)              # transpose once, outside the kernel

    itemsize = jnp.dtype(q.dtype).itemsize
    flops = 2 * d_k * L * d_v_p + 2 * L * d_k * d_v_p
    bytes_accessed = itemsize * (L + L * d_v_p + d_k * L + L * d_k + L * d_v_p)

    out = pl.pallas_call(
        _fused_set_and_forward_kernel,
        out_shape=jax.ShapeDtypeStruct((L, d_v_p), q.dtype),
        grid=(1,),
        in_specs=[
            pl.BlockSpec((L, 1), lambda i: (0, 0)),        # w
            pl.BlockSpec((L, d_v_p), lambda i: (0, 0)),    # v (lane-padded)
            pl.BlockSpec((d_k, L), lambda i: (0, 0)),      # k^T
            pl.BlockSpec((L, d_k), lambda i: (0, 0)),      # q
        ],
        out_specs=pl.BlockSpec((L, d_v_p), lambda i: (0, 0)),
        compiler_params=pltpu.CompilerParams(dimension_semantics=("arbitrary",)),
        cost_estimate=pl.CostEstimate(
            flops=flops, transcendentals=0, bytes_accessed=bytes_accessed),
    )(w2, v_p, k_t, q)
    return out[:, :d_v]


# ---------------------------------------------------------------------------
# Path 2: module-literal forward(q) = q @ J.T, tiled for general shapes
# ---------------------------------------------------------------------------
def _tiled_matmul_kernel(a_ref, b_ref, o_ref, acc_ref):
    @pl.when(pl.program_id(2) == 0)
    def _init():
        acc_ref[...] = jnp.zeros_like(acc_ref)

    acc_ref[...] += jnp.dot(a_ref[...], b_ref[...],
                            preferred_element_type=jnp.float32)

    @pl.when(pl.program_id(2) == pl.num_programs(2) - 1)
    def _store():
        o_ref[...] = acc_ref[...].astype(o_ref.dtype)


def correlation_memory_forward(q, J, *, tm_max=256, tn_max=256, tk_max=512):
    """forward(q) = q @ J.T as a tiled (M, N, K) Pallas matmul.

    J is transposed once in the wrapper so the kernel sees canonical
    (M,K) x (K,N) operands.  Inputs are zero-padded to tile multiples
    (zeros are neutral for the contraction); the result is sliced back.
    """
    L, d_k = q.shape
    d_v, d_k2 = J.shape
    assert d_k == d_k2, f"key-dim mismatch: {d_k} vs {d_k2}"

    j_t = jnp.swapaxes(J, 0, 1)              # (d_k, d_v), canonical RHS

    tm = min(tm_max, _round_up(L, 8))
    tn = min(tn_max, _round_up(d_v, 128))
    tk = min(tk_max, _round_up(d_k, 128))
    mp = _round_up(L, tm)
    np_ = _round_up(d_v, tn)
    kp = _round_up(d_k, tk)

    qp = q if (mp == L and kp == d_k) else jnp.pad(
        q, ((0, mp - L), (0, kp - d_k)))
    jp = j_t if (kp == d_k and np_ == d_v) else jnp.pad(
        j_t, ((0, kp - d_k), (0, np_ - d_v)))

    grid = (mp // tm, np_ // tn, kp // tk)
    itemsize = jnp.dtype(q.dtype).itemsize
    flops = 2 * mp * np_ * kp
    bytes_accessed = itemsize * (mp * kp + kp * np_ + mp * np_)

    out = pl.pallas_call(
        _tiled_matmul_kernel,
        out_shape=jax.ShapeDtypeStruct((mp, np_), q.dtype),
        grid=grid,
        in_specs=[
            pl.BlockSpec((tm, tk), lambda i, j, kk: (i, kk)),
            pl.BlockSpec((tk, tn), lambda i, j, kk: (kk, j)),
        ],
        out_specs=pl.BlockSpec((tm, tn), lambda i, j, kk: (i, j)),
        scratch_shapes=[pltpu.VMEM((tm, tn), jnp.float32)],
        compiler_params=pltpu.CompilerParams(
            dimension_semantics=("parallel", "parallel", "arbitrary")),
        cost_estimate=pl.CostEstimate(
            flops=flops, transcendentals=0, bytes_accessed=bytes_accessed),
    )(qp, jp)
    return out[:L, :d_v]


# ---------------------------------------------------------------------------
# Plain-JAX glue mirroring the module's set_memory (deterministic param setup).
# ---------------------------------------------------------------------------
def make_memory_matrix(w, k, v):
    """set_memory: J = sum_l w_l * outer(v_l, k_l) -> (d_v, d_k)."""
    return (w[:, None] * v).T @ k


if __name__ == "__main__":
    # Small shapes consistent with the module: L data points, d_k keys, d_v values.
    L, d_k, d_v = 8, 32, 16
    dtype = jnp.float32

    key = jax.random.PRNGKey(0)
    kq, kk_, kv, kw = jax.random.split(key, 4)
    q = jax.random.normal(kq, (L, d_k), dtype=dtype)
    k = jax.random.normal(kk_, (L, d_k), dtype=dtype)
    v = jax.random.normal(kv, (L, d_v), dtype=dtype)
    w = jax.random.normal(kw, (L,), dtype=dtype)

    # Deterministic parameter setup via set_memory so the forward matmul is
    # non-trivial (J = zeros from __init__ would be trivially correct).
    J = make_memory_matrix(w, k, v)                              # (d_v, d_k)
    ref = jnp.einsum("lk,vk->lv", q, J,
                     precision=lax.Precision.HIGHEST)            # q @ J.T

    # Path 1: fused set_memory + forward (single launch, J stays on-chip).
    out_fused = jax.block_until_ready(
        correlation_memory_set_and_forward(q, k, v, w))
    assert out_fused.shape == (L, d_v), out_fused.shape
    assert jnp.allclose(out_fused, ref, atol=1e-3, rtol=1e-3), "fused mismatch"

    # Path 2: module-literal forward(q) = q @ J.T via the tiled kernel.
    out_fwd = jax.block_until_ready(correlation_memory_forward(q, J))
    assert out_fwd.shape == (L, d_v), out_fwd.shape
    assert jnp.allclose(out_fwd, ref, atol=1e-3, rtol=1e-3), "forward mismatch"

    # Exercise the multi-block (2,2,2) grid: K-axis accumulation + padding +
    # output slicing, with modest shapes and small tile caps.
    L2, dk2, dv2 = 96, 200, 160
    k2q, k2j = jax.random.split(jax.random.PRNGKey(1))
    q2 = jax.random.normal(k2q, (L2, dk2), dtype=dtype)
    J2 = jax.random.normal(k2j, (dv2, dk2), dtype=dtype)
    ref2 = jnp.einsum("lk,vk->lv", q2, J2, precision=lax.Precision.HIGHEST)
    out2 = jax.block_until_ready(
        correlation_memory_forward(q2, J2, tm_max=64, tn_max=128, tk_max=128))
    assert out2.shape == (L2, dv2), out2.shape
    assert jnp.allclose(out2, ref2, atol=2e-2, rtol=2e-2), "tiled mismatch"

    print("KERNEL_OK")
</pallas_src>

<mosaic_0001>
module attributes {stable_mosaic.version = 11 : i64} {
  func.func @_fused_set_and_forward_kernel(%arg0: i32, %arg1: memref<8x1xf32, #tpu.memory_space<vmem>>, %arg2: memref<8x128xf32, #tpu.memory_space<vmem>>, %arg3: memref<32x8xf32, #tpu.memory_space<vmem>>, %arg4: memref<8x32xf32, #tpu.memory_space<vmem>>, %arg5: memref<8x128xf32, #tpu.memory_space<vmem>>) attributes {dimension_semantics = [#tpu.dimension_semantics<arbitrary>], iteration_bounds = array<i64: 1>, scalar_prefetch = 0 : i64, scratch_operands = 0 : i64, tpu.core_type = #tpu.core_type<tc>, window_params = [{pipeline_mode = #tpu.pipeline_mode<synchronous>, transform_indices = @transform_0, window_bounds = array<i64: 8, 1>}, {pipeline_mode = #tpu.pipeline_mode<synchronous>, transform_indices = @transform_1, window_bounds = array<i64: 8, 128>}, {pipeline_mode = #tpu.pipeline_mode<synchronous>, transform_indices = @transform_2, window_bounds = array<i64: 32, 8>}, {pipeline_mode = #tpu.pipeline_mode<synchronous>, transform_indices = @transform_3, window_bounds = array<i64: 8, 32>}, {pipeline_mode = #tpu.pipeline_mode<synchronous>, transform_indices = @transform_4, window_bounds = array<i64: 8, 128>}]} {
    %c0 = arith.constant 0 : index
    %c0_0 = arith.constant 0 : index
    %0 = vector.load %arg1[%c0, %c0_0] : memref<8x1xf32, #tpu.memory_space<vmem>>, vector<8x1xf32>
    %c0_1 = arith.constant 0 : index
    %c0_2 = arith.constant 0 : index
    %1 = vector.load %arg2[%c0_1, %c0_2] : memref<8x128xf32, #tpu.memory_space<vmem>>, vector<8x128xf32>
    %2 = vector.broadcast %0 : vector<8x1xf32> to vector<8x128xf32>
    %3 = arith.mulf %2, %1 : vector<8x128xf32>
    %c0_3 = arith.constant 0 : index
    %c0_4 = arith.constant 0 : index
    %4 = vector.load %arg3[%c0_3, %c0_4] : memref<32x8xf32, #tpu.memory_space<vmem>>, vector<32x8xf32>
    %cst = arith.constant dense<0.000000e+00> : vector<32x128xf32>
    %5 = tpu.matmul %4, %3, %cst {dimension_numbers = #tpu.dot_dimension_numbers<[1], [0], [0], [1], [0, 0, 1, 1], [], []>} : vector<32x8xf32>, vector<8x128xf32>, vector<32x128xf32> -> vector<32x128xf32>
    %c0_5 = arith.constant 0 : index
    %c0_6 = arith.constant 0 : index
    %6 = vector.load %arg4[%c0_5, %c0_6] : memref<8x32xf32, #tpu.memory_space<vmem>>, vector<8x32xf32>
    %cst_7 = arith.constant dense<0.000000e+00> : vector<8x128xf32>
    %7 = tpu.matmul %6, %5, %cst_7 {dimension_numbers = #tpu.dot_dimension_numbers<[1], [0], [0], [1], [0, 0, 1, 1], [], []>} : vector<8x32xf32>, vector<32x128xf32>, vector<8x128xf32> -> vector<8x128xf32>
    %c0_8 = arith.constant 0 : index
    %c0_9 = arith.constant 0 : index
    %8 = vector.load %arg5[%c0_8, %c0_9] : memref<8x128xf32, #tpu.memory_space<vmem>>, vector<8x128xf32>
    tpu.vector_store %arg5[%c0_8, %c0_9], %7 {strides = array<i32>} : memref<8x128xf32, #tpu.memory_space<vmem>>, vector<8x128xf32>,
    return
  }
  func.func @transform_0(%arg0: i32) -> (i32, i32) {
    %c0_i32 = arith.constant 0 : i32
    %c0_i32_0 = arith.constant 0 : i32
    %c0_i32_1 = arith.constant 0 : i32
    return %c0_i32, %c0_i32_0 : i32, i32
  }
  func.func @transform_1(%arg0: i32) -> (i32, i32) {
    %c0_i32 = arith.constant 0 : i32
    %c0_i32_0 = arith.constant 0 : i32
    %c0_i32_1 = arith.constant 0 : i32
    return %c0_i32, %c0_i32_0 : i32, i32
  }
  func.func @transform_2(%arg0: i32) -> (i32, i32) {
    %c0_i32 = arith.constant 0 : i32
    %c0_i32_0 = arith.constant 0 : i32
    %c0_i32_1 = arith.constant 0 : i32
    return %c0_i32, %c0_i32_0 : i32, i32
  }
  func.func @transform_3(%arg0: i32) -> (i32, i32) {
    %c0_i32 = arith.constant 0 : i32
    %c0_i32_0 = arith.constant 0 : i32
    %c0_i32_1 = arith.constant 0 : i32
    return %c0_i32, %c0_i32_0 : i32, i32
  }
  func.func @transform_4(%arg0: i32) -> (i32, i32) {
    %c0_i32 = arith.constant 0 : i32
    %c0_i32_0 = arith.constant 0 : i32
    %c0_i32_1 = arith.constant 0 : i32
    return %c0_i32, %c0_i32_0 : i32, i32
  }
}

</mosaic_0001>

<bundles_post_ra>
// kernel: tpu_custom_call.1
= control target key start
LH: loop header
LB: loop body
LE: loop exit
PB: predicated region body
PF: predicated region fallthrough
CT: control target
= control target key end

     0   :  { %s351_s0 = inlined_call_operand.vmem [shape: f32[8,1], index: 0, kind: input, shape index: {}]   ;;  %s352_s1 = inlined_call_operand.vmem [shape: f32[8,128], index: 1, kind: input, shape index: {}]   ;;  %s353_s2 = inlined_call_operand.vmem [shape: f32[32,8], index: 2, kind: input, shape index: {}]   ;;  %s354_s3 = inlined_call_operand.vmem [shape: f32[8,32], index: 3, kind: input, shape index: {}]   ;;  %s355_s4 = inlined_call_operand.hbm [shape: f32[8,128], index: 4, kind: output, shape index: {}]  }
   0x1   :  { %v18_v0 = vld [vmem:[%s351_s0] sm:$0xff] }
   0x2   :  { %9 = vsyncpa [#allocation3], 0  ;;  %v288_v1 = vmov 0   ;;  %v26_v2 = vld [vmem:[%s353_s2] sm:$0xff]  ;;  %vm30_vm0 = vcmask 64512   ;;  %v27_v6 = vld [vmem:[%s353_s2 + $0x8] sm:$0xff] }
   0x3   :  { %263 = vset.pattern.permute.xlu0 %v288_v1  ;;  %235 = vmatprep.mubr.msk.f32.mxu0 %vm30_vm0, %v26_v2  ;;  %v19_v3 = vld [vmem:[%s352_s1] sm:$0xff]  ;;  %v28_v7 = vld [vmem:[%s353_s2 + $0x10] sm:$0xff]  ;;  %v29_v8 = vld [vmem:[%s353_s2 + $0x18] sm:$0xff]  ;;  %v289_v9 = vmov 0.0|0.0   ;;  %vm290_vm1 = vmmov 0   ;;  %v291_v10 = vmov 0.0  }
   0x4   :  { %22 = vperm.xlu0 %263, %v18_v0   ;;  %252 = vmatprep.subr.bf16.mxu1 %v289_v9  ;;  %v128_v17 = vld [vmem:[%s354_s3] sm:$0xff]  ;;  %vm129_vm2 = vcmask 261120   ;;  %s292_s2 = smov [#allocation2]  }
   0x5   :  { %249 = vmatprep.mubr.msk.f32.mxu1 %vm290_vm1, %v291_v10  ;;  %s210_s27 = sshll.u32 %s292_s2, 4  ;;  %s211_s27 = int_to_ptr.vmem [resolvable:$true] %s210_s27 }
   0x6   :  { %s264_s28 = scalar_lea.vmem %s211_s27, 128  ;;  %p269_p1 = scmp.lt.s32.totalorder %s211_s27, %s211_s27 }
   0x7   :  { %p265_p0 = scmp.ne.s32.totalorder %s211_s27, %s264_s28  ;;  %p270_p2 = scmp.lt.s32.totalorder %s264_s28, %s264_s28 }
   0x9   :  { %p271_p3 = por %p270_p2, %p269_p1 }
   0xb   :  { %p272_p4 = pnand %p271_p3, %p265_p0 }
  0x83   :  { %v23_v4 = vpop.permute.xlu0 %22 }
  0x84   :  { %v25_v5 = vmul.f32 %v23_v4, %v19_v3 }
  0x86   :  { %233 = vmatprep.subr.mxu0 %v25_v5 }
  0x87   :  { %234 = vmatpush3.msra.mxu0 %v25_v5 }
  0x88   :  { %236 = vmatmul.mubr.msk.f32.vlgmr.msra.gmra.mrb[0].mxu0 %vm30_vm0, %v27_v6 }
  0x89   :  { %238 = vmatprep.mubr.msk.f32.mxu0 %vm30_vm0, %v28_v7 }
  0x8c   :  { %239 = vmatmul.mubr.msk.f32.gmra.mrb[2].mxu0 %vm30_vm0, %v29_v8 }
 0x15b   :  { %v237_v11 = vpop.f32.mrb[0].mxu0 }
 0x15c   :  { %v109_v12 = vpop.f32.mrb[1].mxu0 }
 0x15d   :  { %v253_v13 = vpack.c.bf16 %v237_v11, %v109_v12 }
 0x15f   :  { %v240_v14 = vpop.f32.mrb[2].mxu0  ;;  %254 = vmatpush3.bf16.msra.mxu1 %v253_v13 }
 0x160   :  { %v119_v15 = vpop.f32.mrb[3].mxu0  ;;  %255 = vmatprep.subr.bf16.mxu1 %v289_v9 }
 0x161   :  { %v256_v16 = vpack.c.bf16 %v240_v14, %v119_v15 }
 0x163   :  { %257 = vmatpush3.bf16.msra.mxu1 %v256_v16 }
 0x166   :  { %250 = vmatmul.mubr.msk.f32.vlgmr.msra.gmra.mrb[0].mxu1 %vm129_vm2, %v128_v17 }
 0x239   :  { %v199_v18 = vpop.f32.mrb[0].mxu1 }
 0x23a   :  { %203 = vst [vmem:[#allocation2] sm:$0xff] %v199_v18  ;;  %v251_v19 = vpop.f32.mrb[1].mxu1 }
 0x23b   :  { %275 = shalt.err (!%p272_p4)
}
 0x23c   :  { %s276_s5 = scalar_lea.hbm %s355_s4, 128 }
 0x23d   :  { %p277_p5 = scmp.ne.s32.totalorder %s355_s4, %s276_s5  ;;  %p280_p6 = scmp.lt.u32.totalorder %s276_s5, %s355_s4 }
 0x23f   :  { %p282_p7 = pnand %p280_p6, %p277_p5 }
 0x241   :  { %285 = shalt.err (!%p282_p7)
}
 0x242   :  { %213 = dma.vmem_to_hbm [thread:$0]  %s211_s27, 128, %s355_s4, [#allocation3]  }
 0x243   :  { %286 = dma.done.wait [#allocation3], 128  }
 0x244   :  { %287 = vsyncadd [#allocation3], 4294967168 }
 0x245   :  { %217 = vsyncpa [#allocation3], 1 }

</bundles_post_ra>
